<compile_context>
chip_gen: v5e
topology: v5e:2x2
jax: 0.10.0
libtpu: 0.0.40
codegen_flags: <defaults>
</compile_context>

<pallas_src>
import functools

import jax
import jax.numpy as jnp
from jax import lax
from jax.experimental import pallas as pl
from jax.experimental.pallas import tpu as pltpu

# ---- model hyper-parameters (small, consistent with the module) ----
D_MODEL = 32
N_HEADS = 4
DFF = 64
DIM_HEAD = D_MODEL // N_HEADS
LORA_R = 16
LORA_SCALING = 1.0 / LORA_R
BATCH = 2
SEQ = 8


def _exact_gelu(x):
    # torch.nn.GELU() default: 0.5 * x * (1 + erf(x / sqrt(2)))
    return 0.5 * x * (1.0 + lax.erf(x * (1.0 / jnp.sqrt(jnp.float32(2.0)))))


# ----------------------------- the fused kernel -----------------------------
def _rezero_block_kernel(*refs, has_mask: bool, seq_len: int):
    if has_mask:
        (x_ref, mask_ref, watt_ref, w1_ref, b1_ref, w2_ref, b2_ref,
         alpha_ref, o_ref) = refs
    else:
        (x_ref, watt_ref, w1_ref, b1_ref, w2_ref, b2_ref,
         alpha_ref, o_ref) = refs
        mask_ref = None

    rows, D = x_ref.shape              # rows = block_batches * L
    L = seq_len
    Bt = rows // L                     # batches in this grid step
    H, DH = N_HEADS, DIM_HEAD
    S = 3 * H                          # (part, head) batch for the QKV projection

    x = x_ref[...]                     # (rows, D) flat activations
    alpha = alpha_ref[0, 0]            # ReZero scalar (SMEM)

    # ---- QKV projection, batched over (part, head) ----
    # watt is pre-scattered in the wrapper: watt[part*H + h] is (D, D) with the
    # head's DH output columns placed at lanes [h*DH, (h+1)*DH) and zeros
    # elsewhere, so no lane slicing / relayout is ever needed downstream.
    xb = jnp.broadcast_to(x[None], (S, rows, D))                     # cheap vreg copies
    qkv = jnp.einsum('snd,sde->sne', xb, watt_ref[...],
                     preferred_element_type=jnp.float32)             # (3H, rows, D)

    # Split rows -> (Bt, L): 8-aligned sublane split, layout-preserving.
    qkv = qkv.reshape(S * Bt, L, D)
    q = qkv[: H * Bt]                  # (H*Bt, L, D)  zero outside the head's lanes
    k = qkv[H * Bt: 2 * H * Bt]
    v = qkv[2 * H * Bt:]

    # ---- batched-head attention (zero-padded lanes contribute exactly 0) ----
    scores = jnp.einsum('nld,nmd->nlm', q, k,
                        preferred_element_type=jnp.float32)          # (H*Bt, L, L)
    scores = scores * (1.0 / jnp.sqrt(jnp.float32(DH)))
    if has_mask:
        scores = scores + mask_ref[...][None, :, :]                  # additive mask
    scores = scores - jnp.max(scores, axis=-1, keepdims=True)
    p = jnp.exp(scores)
    p = p * pl.reciprocal(jnp.sum(p, axis=-1, keepdims=True), approx=True)

    ctx = jnp.einsum('nlm,nmd->nld', p, v,
                     preferred_element_type=jnp.float32)             # (H*Bt, L, D)

    # Head concat == sum over the zero-padded head axis (no transpose / concat).
    ctx = ctx.reshape(H, rows, D)      # 8-aligned sublane merge, layout-preserving
    attn = ctx[0]
    for h in range(1, H):
        attn = attn + ctx[h]           # (rows, D)

    # ---- ReZero residual 1 (dropout = identity in eval) ----
    x1 = attn * alpha + x

    # ---- FFN (LoRA-merged weights) on the flat (rows, D) slab ----
    h1 = jnp.dot(x1, w1_ref[...], preferred_element_type=jnp.float32) + b1_ref[...]
    h1 = _exact_gelu(h1)
    ffn = jnp.dot(h1, w2_ref[...], preferred_element_type=jnp.float32) + b2_ref[...]

    # ---- ReZero residual 2 ----
    o_ref[...] = ffn * alpha + x1


# ------------------- wrapper-side parameter preparation -------------------
def _prep_attention_weights(wqkv):
    """PyTorch interleaved (D, 3D) QKV weight -> head-major, lane-scattered (3H, D, D).

    Column layout of wqkv (matching the torch module): col = h*3*DH + part*DH + d.
    Output: out[part*H + h] is (D, D) with the head's columns at lanes
    [h*DH, (h+1)*DH) and zeros elsewhere.  Done once per layer in plain JAX.
    """
    D, H, DH = D_MODEL, N_HEADS, DIM_HEAD
    w = wqkv.reshape(D, H, 3, DH)                  # (D, H, part, DH)
    w = jnp.transpose(w, (2, 1, 0, 3))             # (part, H, D, DH)
    wide = jnp.zeros((3, H, D, D), jnp.float32)
    for h in range(H):
        wide = wide.at[:, h, :, h * DH:(h + 1) * DH].set(w[:, h])
    return wide.reshape(3 * H, D, D)


# ----------------------------- wrapper -----------------------------
def rezero_transformer_block(x, wqkv, w1, b1, w2, b2, alpha, attn_mask=None,
                             *, block_batches=None):
    """x: (B, L, D). wqkv in the PyTorch per-head-interleaved column layout.

    block_batches: how many batches each grid step processes (default: all of
    them -> single grid step). Smaller tiles enable megacore split on v7x and
    bound VMEM when B*L is large.
    """
    B, L, D = x.shape
    if block_batches is None:
        block_batches = B
    assert B % block_batches == 0
    rows = block_batches * L
    num_tiles = B // block_batches

    # Parameter prep (plain-JAX glue, outside the kernel; precompute per layer in
    # real use).
    w_att = _prep_attention_weights(wqkv)
    x_flat = x.reshape(B * L, D)       # free metadata reshape outside the kernel

    has_mask = attn_mask is not None
    kernel = functools.partial(_rezero_block_kernel, has_mask=has_mask, seq_len=L)

    in_specs = [pl.BlockSpec((rows, D), lambda i: (i, 0))]            # activations
    if has_mask:
        in_specs.append(pl.BlockSpec((L, L), lambda i: (0, 0)))       # shared mask
    in_specs += [
        pl.BlockSpec((3 * N_HEADS, D, D), lambda i: (0, 0, 0)),       # attn weights
        pl.BlockSpec((D, DFF), lambda i: (0, 0)),                     # w1
        pl.BlockSpec((1, DFF), lambda i: (0, 0)),                     # b1
        pl.BlockSpec((DFF, D), lambda i: (0, 0)),                     # w2
        pl.BlockSpec((1, D), lambda i: (0, 0)),                       # b2
        pl.BlockSpec((1, 1), lambda i: (0, 0),
                     memory_space=pltpu.MemorySpace.SMEM),            # alpha scalar
    ]
    out_spec = pl.BlockSpec((rows, D), lambda i: (i, 0))

    tensor_args = (x_flat,) + ((attn_mask,) if has_mask else ()) + (
        w_att, w1, b1, w2, b2, alpha)

    out_flat = pl.pallas_call(
        kernel,
        out_shape=jax.ShapeDtypeStruct((B * L, D), jnp.float32),
        grid=(num_tiles,),
        in_specs=in_specs,
        out_specs=out_spec,
        compiler_params=pltpu.CompilerParams(
            dimension_semantics=("parallel",)),       # lets v7x megacore split tiles
    )(*tensor_args)
    return out_flat.reshape(B, L, D)


# ---------------- parameter construction (plain-JAX glue) ----------------
def make_params(key):
    ks = jax.random.split(key, 12)

    def lora_linear(k_base, k_a, k_b, d_in, d_out):
        # base weight (out, in), lora_A (r, in), lora_B (out, r) -> merged (in, out)
        w = jax.random.normal(k_base, (d_out, d_in), jnp.float32) * 0.05
        a = jax.random.normal(k_a, (LORA_R, d_in), jnp.float32) * 0.05
        b = jax.random.normal(k_b, (d_out, LORA_R), jnp.float32) * 0.05
        w_eff = w + LORA_SCALING * (b @ a)
        return w_eff.T  # (in, out) for x @ W

    wqkv = lora_linear(ks[0], ks[1], ks[2], D_MODEL, 3 * D_MODEL)   # (D, 3D), no bias
    w1 = lora_linear(ks[3], ks[4], ks[5], D_MODEL, DFF)             # (D, dff)
    b1 = jax.random.normal(ks[6], (1, DFF), jnp.float32) * 0.05
    w2 = lora_linear(ks[7], ks[8], ks[9], DFF, D_MODEL)             # (dff, D)
    b2 = jax.random.normal(ks[10], (1, D_MODEL), jnp.float32) * 0.05
    alpha = jnp.full((1, 1), 0.1, jnp.float32)  # torch init is 0 (identity); nonzero here
    return wqkv, w1, b1, w2, b2, alpha


# ---------------- pure-JAX reference (mirrors PyTorch forward exactly) ----------------
def reference(x, mask, wqkv, w1, b1, w2, b2, alpha):
    B, L, D = x.shape
    a = alpha[0, 0]
    qkv = x @ wqkv                                              # (B, L, 3D) interleaved
    qkv = qkv.reshape(B, L, N_HEADS, 3 * DIM_HEAD).transpose(0, 2, 1, 3)
    Q = qkv[..., :DIM_HEAD]
    K = qkv[..., DIM_HEAD:2 * DIM_HEAD]
    V = qkv[..., 2 * DIM_HEAD:]
    scores = Q @ jnp.swapaxes(K, -1, -2) / jnp.sqrt(jnp.float32(DIM_HEAD))
    if mask is not None:
        scores = scores + mask
    p = jax.nn.softmax(scores, axis=-1)
    o = (p @ V).transpose(0, 2, 1, 3).reshape(B, L, D)
    x1 = o * a + x
    h = _exact_gelu(x1 @ w1 + b1)
    f = h @ w2 + b2
    return f * a + x1


if __name__ == "__main__":
    key = jax.random.PRNGKey(0)
    k_x, k_p = jax.random.split(key)

    x = jax.random.normal(k_x, (BATCH, SEQ, D_MODEL), jnp.float32)
    wqkv, w1, b1, w2, b2, alpha = make_params(k_p)

    # --- attn_mask=None path (PyTorch default): single grid step, no mask operand ---
    out = rezero_transformer_block(x, wqkv, w1, b1, w2, b2, alpha, attn_mask=None)
    out = jax.block_until_ready(out)
    ref = reference(x, None, wqkv, w1, b1, w2, b2, alpha)
    assert out.shape == ref.shape == (BATCH, SEQ, D_MODEL)
    assert jnp.allclose(out, ref, rtol=1e-3, atol=1e-3), (
        f"max err {jnp.max(jnp.abs(out - ref))}")

    # --- masked path, exercising the batch-tiled grid (grid=(B,), parallel) ---
    mask = jnp.where(jnp.arange(SEQ)[:, None] >= jnp.arange(SEQ)[None, :],
                     0.0, -1e9).astype(jnp.float32)
    out_m = rezero_transformer_block(x, wqkv, w1, b1, w2, b2, alpha,
                                     attn_mask=mask, block_batches=1)
    out_m = jax.block_until_ready(out_m)
    ref_m = reference(x, mask, wqkv, w1, b1, w2, b2, alpha)
    assert jnp.allclose(out_m, ref_m, rtol=1e-3, atol=1e-3), (
        f"max err {jnp.max(jnp.abs(out_m - ref_m))}")

    print("KERNEL_OK")
</pallas_src>

<mosaic_0001>
module attributes {stable_mosaic.version = 11 : i64} {
  func.func @_rezero_block_kernel(%arg0: i32, %arg1: memref<16x32xf32, #tpu.memory_space<vmem>>, %arg2: memref<12x32x32xf32, #tpu.memory_space<vmem>>, %arg3: memref<32x64xf32, #tpu.memory_space<vmem>>, %arg4: memref<1x64xf32, #tpu.memory_space<vmem>>, %arg5: memref<64x32xf32, #tpu.memory_space<vmem>>, %arg6: memref<1x32xf32, #tpu.memory_space<vmem>>, %arg7: memref<1x1xf32, #tpu.memory_space<smem>>, %arg8: memref<16x32xf32, #tpu.memory_space<vmem>>) attributes {dimension_semantics = [#tpu.dimension_semantics<parallel>], iteration_bounds = array<i64: 1>, scalar_prefetch = 0 : i64, scratch_operands = 0 : i64, tpu.core_type = #tpu.core_type<tc>, window_params = [{transform_indices = @transform_0, window_bounds = array<i64: 16, 32>}, {pipeline_mode = #tpu.pipeline_mode<synchronous>, transform_indices = @transform_1, window_bounds = array<i64: 12, 32, 32>}, {pipeline_mode = #tpu.pipeline_mode<synchronous>, transform_indices = @transform_2, window_bounds = array<i64: 32, 64>}, {pipeline_mode = #tpu.pipeline_mode<synchronous>, transform_indices = @transform_3, window_bounds = array<i64: 1, 64>}, {pipeline_mode = #tpu.pipeline_mode<synchronous>, transform_indices = @transform_4, window_bounds = array<i64: 64, 32>}, {pipeline_mode = #tpu.pipeline_mode<synchronous>, transform_indices = @transform_5, window_bounds = array<i64: 1, 32>}, {transform_indices = @transform_6, window_bounds = array<i64: 1, 1>}, {transform_indices = @transform_7, window_bounds = array<i64: 16, 32>}]} {
    %c0 = arith.constant 0 : index
    %c0_0 = arith.constant 0 : index
    %0 = vector.load %arg1[%c0, %c0_0] : memref<16x32xf32, #tpu.memory_space<vmem>>, vector<16x32xf32>
    %c0_1 = arith.constant 0 : index
    %c0_2 = arith.constant 0 : index
    %1 = memref.load %arg7[%c0_1, %c0_2] : memref<1x1xf32, #tpu.memory_space<smem>>
    %2 = vector.shape_cast %0 : vector<16x32xf32> to vector<1x16x32xf32>
    %3 = vector.shape_cast %2 : vector<1x16x32xf32> to vector<1x16x32xf32>
    %4 = vector.broadcast %3 : vector<1x16x32xf32> to vector<12x16x32xf32>
    %c0_3 = arith.constant 0 : index
    %c0_4 = arith.constant 0 : index
    %c0_5 = arith.constant 0 : index
    %5 = vector.load %arg2[%c0_3, %c0_4, %c0_5] : memref<12x32x32xf32, #tpu.memory_space<vmem>>, vector<12x32x32xf32>
    "tpu.trace_start"() <{level = 10 : i32, message = "snd,sde->sne"}> : () -> ()
    %cst = arith.constant dense<0.000000e+00> : vector<12x16x32xf32>
    %6 = tpu.matmul %4, %5, %cst {dimension_numbers = #tpu.dot_dimension_numbers<[2], [1], [1], [2], [0, 0, 0, 1, 1, 2], [0], [0]>} : vector<12x16x32xf32>, vector<12x32x32xf32>, vector<12x16x32xf32> -> vector<12x16x32xf32>
    "tpu.trace_stop"() : () -> ()
    %7 = vector.shape_cast %6 : vector<12x16x32xf32> to vector<24x8x32xf32>
    %8 = vector.extract_strided_slice %7 {offsets = [0, 0, 0], sizes = [8, 8, 32], strides = [1, 1, 1]} : vector<24x8x32xf32> to vector<8x8x32xf32>
    %9 = vector.extract_strided_slice %7 {offsets = [8, 0, 0], sizes = [8, 8, 32], strides = [1, 1, 1]} : vector<24x8x32xf32> to vector<8x8x32xf32>
    %10 = vector.extract_strided_slice %7 {offsets = [16, 0, 0], sizes = [8, 8, 32], strides = [1, 1, 1]} : vector<24x8x32xf32> to vector<8x8x32xf32>
    "tpu.trace_start"() <{level = 10 : i32, message = "nld,nmd->nlm"}> : () -> ()
    %cst_6 = arith.constant dense<0.000000e+00> : vector<8x8x8xf32>
    %11 = tpu.matmul %8, %9, %cst_6 {dimension_numbers = #tpu.dot_dimension_numbers<[2], [2], [1], [1], [0, 0, 0, 1, 1, 1], [0], [0]>} : vector<8x8x32xf32>, vector<8x8x32xf32>, vector<8x8x8xf32> -> vector<8x8x8xf32>
    %cst_7 = arith.constant 8.000000e+00 : f32
    "tpu.trace_stop"() : () -> ()
    %12 = math.sqrt %cst_7 : f32
    %cst_8 = arith.constant 1.000000e+00 : f32
    %13 = arith.divf %cst_8, %12 : f32
    %14 = vector.broadcast %13 : f32 to vector<8x8x8xf32>
    %15 = arith.mulf %11, %14 : vector<8x8x8xf32>
    %cst_9 = arith.constant dense<0xFF800000> : vector<8x8xf32>
    %16 = vector.multi_reduction <maximumf>, %15, %cst_9 [2] : vector<8x8x8xf32> to vector<8x8xf32>
    %17 = vector.shape_cast %16 : vector<8x8xf32> to vector<8x8x1xf32>
    %18 = vector.broadcast %17 : vector<8x8x1xf32> to vector<8x8x8xf32>
    %19 = arith.subf %15, %18 : vector<8x8x8xf32>
    %20 = math.exp %19 : vector<8x8x8xf32>
    %cst_10 = arith.constant dense<0.000000e+00> : vector<8x8xf32>
    %21 = vector.multi_reduction <add>, %20, %cst_10 [2] : vector<8x8x8xf32> to vector<8x8xf32>
    %22 = vector.shape_cast %21 : vector<8x8xf32> to vector<8x8x1xf32>
    %23 = tpu.reciprocal %22 {approx = true} : vector<8x8x1xf32> -> vector<8x8x1xf32>
    %24 = vector.broadcast %23 : vector<8x8x1xf32> to vector<8x8x8xf32>
    %25 = arith.mulf %20, %24 : vector<8x8x8xf32>
    "tpu.trace_start"() <{level = 10 : i32, message = "nlm,nmd->nld"}> : () -> ()
    %cst_11 = arith.constant dense<0.000000e+00> : vector<8x8x32xf32>
    %26 = tpu.matmul %25, %10, %cst_11 {dimension_numbers = #tpu.dot_dimension_numbers<[2], [1], [1], [2], [0, 0, 0, 1, 1, 2], [0], [0]>} : vector<8x8x8xf32>, vector<8x8x32xf32>, vector<8x8x32xf32> -> vector<8x8x32xf32>
    "tpu.trace_stop"() : () -> ()
    %27 = vector.shape_cast %26 : vector<8x8x32xf32> to vector<4x16x32xf32>
    %28 = vector.extract_strided_slice %27 {offsets = [0, 0, 0], sizes = [1, 16, 32], strides = [1, 1, 1]} : vector<4x16x32xf32> to vector<1x16x32xf32>
    %29 = vector.shape_cast %28 : vector<1x16x32xf32> to vector<16x32xf32>
    %30 = vector.extract_strided_slice %27 {offsets = [1, 0, 0], sizes = [1, 16, 32], strides = [1, 1, 1]} : vector<4x16x32xf32> to vector<1x16x32xf32>
    %31 = vector.shape_cast %30 : vector<1x16x32xf32> to vector<16x32xf32>
    %32 = arith.addf %29, %31 : vector<16x32xf32>
    %33 = vector.extract_strided_slice %27 {offsets = [2, 0, 0], sizes = [1, 16, 32], strides = [1, 1, 1]} : vector<4x16x32xf32> to vector<1x16x32xf32>
    %34 = vector.shape_cast %33 : vector<1x16x32xf32> to vector<16x32xf32>
    %35 = arith.addf %32, %34 : vector<16x32xf32>
    %36 = vector.extract_strided_slice %27 {offsets = [3, 0, 0], sizes = [1, 16, 32], strides = [1, 1, 1]} : vector<4x16x32xf32> to vector<1x16x32xf32>
    %37 = vector.shape_cast %36 : vector<1x16x32xf32> to vector<16x32xf32>
    %38 = arith.addf %35, %37 : vector<16x32xf32>
    %39 = vector.broadcast %1 : f32 to vector<16x32xf32>
    %40 = arith.mulf %38, %39 : vector<16x32xf32>
    %41 = arith.addf %40, %0 : vector<16x32xf32>
    %c0_12 = arith.constant 0 : index
    %c0_13 = arith.constant 0 : index
    %42 = vector.load %arg3[%c0_12, %c0_13] : memref<32x64xf32, #tpu.memory_space<vmem>>, vector<32x64xf32>
    %cst_14 = arith.constant dense<0.000000e+00> : vector<16x64xf32>
    %43 = tpu.matmul %41, %42, %cst_14 {dimension_numbers = #tpu.dot_dimension_numbers<[1], [0], [0], [1], [0, 0, 1, 1], [], []>} : vector<16x32xf32>, vector<32x64xf32>, vector<16x64xf32> -> vector<16x64xf32>
    %c0_15 = arith.constant 0 : index
    %c0_16 = arith.constant 0 : index
    %44 = vector.load %arg4[%c0_15, %c0_16] : memref<1x64xf32, #tpu.memory_space<vmem>>, vector<1x64xf32>
    %45 = vector.broadcast %44 : vector<1x64xf32> to vector<16x64xf32>
    %46 = arith.addf %43, %45 : vector<16x64xf32>
    %cst_17 = arith.constant 5.000000e-01 : f32
    %47 = vector.broadcast %cst_17 : f32 to vector<16x64xf32>
    %48 = arith.mulf %47, %46 : vector<16x64xf32>
    %cst_18 = arith.constant 2.000000e+00 : f32
    %49 = math.sqrt %cst_18 : f32
    %cst_19 = arith.constant 1.000000e+00 : f32
    %50 = arith.divf %cst_19, %49 : f32
    %51 = vector.broadcast %50 : f32 to vector<16x64xf32>
    %52 = arith.mulf %46, %51 : vector<16x64xf32>
    %53 = math.erf %52 : vector<16x64xf32>
    %cst_20 = arith.constant 1.000000e+00 : f32
    %54 = vector.broadcast %cst_20 : f32 to vector<16x64xf32>
    %55 = arith.addf %54, %53 : vector<16x64xf32>
    %56 = arith.mulf %48, %55 : vector<16x64xf32>
    %c0_21 = arith.constant 0 : index
    %c0_22 = arith.constant 0 : index
    %57 = vector.load %arg5[%c0_21, %c0_22] : memref<64x32xf32, #tpu.memory_space<vmem>>, vector<64x32xf32>
    %cst_23 = arith.constant dense<0.000000e+00> : vector<16x32xf32>
    %58 = tpu.matmul %56, %57, %cst_23 {dimension_numbers = #tpu.dot_dimension_numbers<[1], [0], [0], [1], [0, 0, 1, 1], [], []>} : vector<16x64xf32>, vector<64x32xf32>, vector<16x32xf32> -> vector<16x32xf32>
    %c0_24 = arith.constant 0 : index
    %c0_25 = arith.constant 0 : index
    %59 = vector.load %arg6[%c0_24, %c0_25] : memref<1x32xf32, #tpu.memory_space<vmem>>, vector<1x32xf32>
    %60 = vector.broadcast %59 : vector<1x32xf32> to vector<16x32xf32>
    %61 = arith.addf %58, %60 : vector<16x32xf32>
    %62 = vector.broadcast %1 : f32 to vector<16x32xf32>
    %63 = arith.mulf %61, %62 : vector<16x32xf32>
    %64 = arith.addf %63, %41 : vector<16x32xf32>
    %c0_26 = arith.constant 0 : index
    %c0_27 = arith.constant 0 : index
    %65 = vector.load %arg8[%c0_26, %c0_27] : memref<16x32xf32, #tpu.memory_space<vmem>>, vector<16x32xf32>
    tpu.vector_store %arg8[%c0_26, %c0_27], %64 {strides = array<i32>} : memref<16x32xf32, #tpu.memory_space<vmem>>, vector<16x32xf32>,
    return
  }
  func.func @transform_0(%arg0: i32) -> (i32, i32) {
    %c0_i32 = arith.constant 0 : i32
    %c0_i32_0 = arith.constant 0 : i32
    return %arg0, %c0_i32 : i32, i32
  }
  func.func @transform_1(%arg0: i32) -> (i32, i32, i32) {
    %c0_i32 = arith.constant 0 : i32
    %c0_i32_0 = arith.constant 0 : i32
    %c0_i32_1 = arith.constant 0 : i32
    %c0_i32_2 = arith.constant 0 : i32
    return %c0_i32, %c0_i32_0, %c0_i32_1 : i32, i32, i32
  }
  func.func @transform_2(%arg0: i32) -> (i32, i32) {
    %c0_i32 = arith.constant 0 : i32
    %c0_i32_0 = arith.constant 0 : i32
    %c0_i32_1 = arith.constant 0 : i32
    return %c0_i32, %c0_i32_0 : i32, i32
  }
  func.func @transform_3(%arg0: i32) -> (i32, i32) {
    %c0_i32 = arith.constant 0 : i32
    %c0_i32_0 = arith.constant 0 : i32
    %c0_i32_1 = arith.constant 0 : i32
    return %c0_i32, %c0_i32_0 : i32, i32
  }
  func.func @transform_4(%arg0: i32) -> (i32, i32) {
    %c0_i32 = arith.constant 0 : i32
    %c0_i32_0 = arith.constant 0 : i32
    %c0_i32_1 = arith.constant 0 : i32
    return %c0_i32, %c0_i32_0 : i32, i32
  }
  func.func @transform_5(%arg0: i32) -> (i32, i32) {
    %c0_i32 = arith.constant 0 : i32
    %c0_i32_0 = arith.constant 0 : i32
    %c0_i32_1 = arith.constant 0 : i32
    return %c0_i32, %c0_i32_0 : i32, i32
  }
  func.func @transform_6(%arg0: i32) -> (i32, i32) {
    %c0_i32 = arith.constant 0 : i32
    %c0_i32_0 = arith.constant 0 : i32
    %c0_i32_1 = arith.constant 0 : i32
    return %c0_i32, %c0_i32_0 : i32, i32
  }
  func.func @transform_7(%arg0: i32) -> (i32, i32) {
    %c0_i32 = arith.constant 0 : i32
    %c0_i32_0 = arith.constant 0 : i32
    return %arg0, %c0_i32 : i32, i32
  }
}

</mosaic_0001>

<bundles_post_ra>
// kernel: tpu_custom_call.1
= control target key start
LH: loop header
LB: loop body
LE: loop exit
PB: predicated region body
PF: predicated region fallthrough
CT: control target
= control target key end

     0   :  { %13 = vsyncpa [#allocation4], 0  ;;  %s1459_s0 = inlined_call_operand.vmem [shape: f32[16,32], index: 0, kind: input, shape index: {}]   ;;  %s1460_s1 = inlined_call_operand.hbm [shape: f32[12,32,32], index: 1, kind: input, shape index: {}]   ;;  %s1461_s2 = inlined_call_operand.vmem [shape: f32[32,64], index: 2, kind: input, shape index: {}]   ;;  %s1462_s3 = inlined_call_operand.vmem [shape: f32[1,64], index: 3, kind: input, shape index: {}]   ;;  %s1463_s4 = inlined_call_operand.vmem [shape: f32[64,32], index: 4, kind: input, shape index: {}]   ;;  %s1464_s5 = inlined_call_operand.vmem [shape: f32[1,32], index: 5, kind: input, shape index: {}]   ;;  %s1465_s6 = inlined_call_operand.<no memory space> [shape: f32[1,1], index: 6, kind: input, shape index: {}]   ;;  %s1466_s7 = inlined_call_operand.hbm [shape: f32[16,32], index: 7, kind: output, shape index: {}]  }
   0x1   :  { %14 = vsyncpa [#allocation5], 0  ;;  %s21_s26 = sshll.u32 %s1460_s1, 4  ;;  %s1222_s27 = smov [#allocation3]   ;;  %s22_s26 = int_to_ptr.hbm [resolvable:$true] %s21_s26 }
   0x2   :  { %s23_s28 = sshll.u32 %s1222_s27, 4  ;;  %s1223_s29 = smov 128   ;;  %s24_s28 = int_to_ptr.vmem [resolvable:$true] %s23_s28 }
   0x3   :  { %s1224_s30 = smov 8  }
   0x4   :  { %29 = dma.hbm_to_vmem [thread:$0]  %s22_s26, 6144, %s24_s28, [#allocation4], %s1223_s29, %s1223_s29, %s1224_s30  }
   0x5   :  { %1218 = dma.done.wait [#allocation4], 6144  }
   0x6   :  { %1219 = vsyncadd [#allocation4], 4294961152  ;;  %v50_v0 = vld [vmem:[#allocation3 + $0x18] sm:$0xff]  ;;  %v49_v2 = vld [vmem:[#allocation3 + $0x10] sm:$0xff]  ;;  %vm95_vm0 = vcmask 261120   ;;  %vm594_vm1 = vcmask 64512  }
   0x7   :  { %v54_v1 = vld [vmem:[#allocation3 + $0x38] sm:$0xff]  ;;  %114 = vmatpush.msra.mxu0 %v50_v0  ;;  %1124 = vmatpush.msra.mxu3 %v50_v0  ;;  %v53_v3 = vld [vmem:[#allocation3 + $0x30] sm:$0xff]  ;;  %v48_v5 = vld [vmem:[#allocation3 + $0x8] sm:$0xff]  ;;  %vm1015_vm8 = vcmask 523264   ;;  %s1225_s13 = smov [#allocation6]   ;;  %s1057_s17 = sshll.u32 %s1466_s7, 4  ;;  %s1058_s17 = int_to_ptr.hbm [resolvable:$true] %s1057_s17 }
   0x8   :  { %v70_v4 = vld [vmem:[#allocation3 + $0xb8] sm:$0xff]  ;;  %137 = vmatpush.msra.mxu2 %v54_v1  ;;  %v69_v6 = vld [vmem:[#allocation3 + $0xb0] sm:$0xff]  ;;  %v52_v7 = vld [vmem:[#allocation3 + $0x28] sm:$0xff]  ;;  %s1055_s14 = sshll.u32 %s1225_s13, 4  ;;  %s1056_s14 = int_to_ptr.vmem [resolvable:$true] %s1055_s14 }
   0x9   :  { %229 = vmatpush.msra.mxu1 %v70_v4  ;;  %115 = vmatpush.msra.mxu0 %v49_v2  ;;  %v47_v8 = vld [vmem:[#allocation3] sm:$0xff]  ;;  %v68_v9 = vld [vmem:[#allocation3 + $0xa8] sm:$0xff]  ;;  %v62_v13 = vld [vmem:[#allocation3 + $0x78] sm:$0xff] }
   0xa   :  { %1125 = vmatpush.msra.mxu3 %v49_v2  ;;  %138 = vmatpush.msra.mxu2 %v53_v3  ;;  %v51_v10 = vld [vmem:[#allocation3 + $0x20] sm:$0xff]  ;;  %v1280_v12 = vld [vmem:[%s1459_s0 + $0x8] sm:$0xff]  ;;  %v66_v14 = vld [vmem:[#allocation3 + $0x98] sm:$0xff] }
   0xb   :  { %230 = vmatpush.msra.mxu1 %v69_v6  ;;  %116 = vmatpush.msra.mxu0 %v48_v5  ;;  %v1275_v11 = vld [vmem:[%s1459_s0] sm:$0xff]  ;;  %v58_v16 = vld [vmem:[#allocation3 + $0x58] sm:$0xff]  ;;  %v61_v17 = vld [vmem:[#allocation3 + $0x70] sm:$0xff] }
   0xc   :  { %1126 = vmatpush.msra.mxu3 %v48_v5  ;;  %139 = vmatpush.msra.mxu2 %v52_v7  ;;  %v67_v15 = vld [vmem:[#allocation3 + $0xa0] sm:$0xff]  ;;  %v65_v18 = vld [vmem:[#allocation3 + $0x90] sm:$0xff]  ;;  %v60_v19 = vld [vmem:[#allocation3 + $0x68] sm:$0xff] }
   0xd   :  { %231 = vmatpush.msra.mxu1 %v68_v9  ;;  %117 = vmatpush.msra.mxu0 %v47_v8  ;;  %v57_v20 = vld [vmem:[#allocation3 + $0x50] sm:$0xff]  ;;  %v64_v21 = vld [vmem:[#allocation3 + $0x88] sm:$0xff]  ;;  %v59_v23 = vld [vmem:[#allocation3 + $0x60] sm:$0xff] }
   0xe   :  { %1127 = vmatpush.msra.mxu3 %v47_v8  ;;  %140 = vmatpush.msra.mxu2 %v51_v10  ;;  %v56_v22 = vld [vmem:[#allocation3 + $0x48] sm:$0xff]  ;;  %v63_v24 = vld [vmem:[#allocation3 + $0x80] sm:$0xff]  ;;  %v78_v25 = vld [vmem:[#allocation3 + $0xf8] sm:$0xff] }
   0xf   :  { %1070 = vmatmul.msk.f32.vlgmr.msra.gmra.mxu0 %vm95_vm0, %v1275_v11  ;;  %1071 = vmatmul.msk.f32.vlgmr.msra.gmra.mxu3 %vm95_vm0, %v1280_v12  ;;  %v55_v26 = vld [vmem:[#allocation3 + $0x40] sm:$0xff]  ;;  %v77_v27 = vld [vmem:[#allocation3 + $0xf0] sm:$0xff]  ;;  %v74_v28 = vld [vmem:[#allocation3 + $0xd8] sm:$0xff] }
  0x10   :  { %1072 = vmatmul.msk.f32.vlgmr.msra.gmra.mxu2 %vm95_vm0, %v1275_v11  ;;  %183 = vmatpush.msrb.mxu3 %v62_v13  ;;  %v82_v29 = vld [vmem:[#allocation3 + $0x118] sm:$0xff]  ;;  %v81_v30 = vld [vmem:[#allocation3 + $0x110] sm:$0xff]  ;;  %v76_v31 = vld [vmem:[#allocation3 + $0xe8] sm:$0xff] }
  0x11   :  { %206 = vmatpush.msrb.mxu0 %v66_v14  ;;  %232 = vmatpush.msra.mxu1 %v67_v15  ;;  %v73_v32 = vld [vmem:[#allocation3 + $0xd0] sm:$0xff]  ;;  %v75_v33 = vld [vmem:[#allocation3 + $0xe0] sm:$0xff]  ;;  %v72_v34 = vld [vmem:[#allocation3 + $0xc8] sm:$0xff] }
  0x12   :  { %160 = vmatpush.msrb.mxu2 %v58_v16  ;;  %184 = vmatpush.msrb.mxu3 %v61_v17  ;;  %v71_v35 = vld [vmem:[#allocation3 + $0xc0] sm:$0xff]  ;;  %v90_v36 = vld [vmem:[#allocation3 + $0x158] sm:$0xff]  ;;  %v80_v38 = vld [vmem:[#allocation3 + $0x108] sm:$0xff] }
  0x13   :  { %207 = vmatpush.msrb.mxu0 %v65_v18  ;;  %1080 = vmatmul.msk.f32.vlgmr.msra.gmra.mxu1 %vm95_vm0, %v1275_v11  ;;  %v94_v37 = vld [vmem:[#allocation3 + $0x178] sm:$0xff]  ;;  %v89_v39 = vld [vmem:[#allocation3 + $0x150] sm:$0xff]  ;;  %v79_v42 = vld [vmem:[#allocation3 + $0x100] sm:$0xff] }
  0x14   :  { %161 = vmatpush.msrb.mxu2 %v57_v20  ;;  %185 = vmatpush.msrb.mxu3 %v60_v19  ;;  %v93_v40 = vld [vmem:[#allocation3 + $0x170] sm:$0xff]  ;;  %v86_v41 = vld [vmem:[#allocation3 + $0x138] sm:$0xff]  ;;  %v88_v44 = vld [vmem:[#allocation3 + $0x148] sm:$0xff] }
  0x15   :  { %208 = vmatpush.msrb.mxu0 %v64_v21  ;;  %v85_v43 = vld [vmem:[#allocation3 + $0x130] sm:$0xff]  ;;  %v92_v45 = vld [vmem:[#allocation3 + $0x168] sm:$0xff]  ;;  %321 = vmatpush.msrb.mxu1 %v86_v41  ;;  %v87_v46 = vld [vmem:[#allocation3 + $0x140] sm:$0xff] }
  0x16   :  { %162 = vmatpush.msrb.mxu2 %v56_v22  ;;  %186 = vmatpush.msrb.mxu3 %v59_v23  ;;  %v91_v47 = vld [vmem:[#allocation3 + $0x160] sm:$0xff]  ;;  %v84_v48 = vld [vmem:[#allocation3 + $0x128] sm:$0xff] }
  0x17   :  { %209 = vmatpush.msrb.mxu0 %v63_v24  ;;  %1076 = vmatmul.msk.f32.vlgmr.msrb.gmra.mxu3 %vm95_vm0, %v1275_v11  ;;  %v83_v49 = vld [vmem:[#allocation3 + $0x120] sm:$0xff] }
  0x18   :  { %1073 = vmatmul.msk.f32.gmra.mxu2 %vm95_vm0, %v1280_v12  ;;  %1078 = vmatmul.msk.f32.vlgmr.msrb.gmra.mxu0 %vm95_vm0, %v1275_v11 }
  0x19   :  { %275 = vmatpush.msra.mxu3 %v78_v25  ;;  %163 = vmatpush.msrb.mxu2 %v55_v26 }
  0x1a   :  { %298 = vmatpush.msra.mxu0 %v82_v29  ;;  %322 = vmatpush.msrb.mxu1 %v85_v43 }
  0x1b   :  { %276 = vmatpush.msra.mxu3 %v77_v27  ;;  %252 = vmatpush.msra.mxu2 %v74_v28 }
  0x1c   :  { %1081 = vmatmul.msk.f32.gmra.mxu1 %vm95_vm0, %v1280_v12  ;;  %299 = vmatpush.msra.mxu0 %v81_v30 }
  0x1d   :  { %277 = vmatpush.msra.mxu3 %v76_v31  ;;  %253 = vmatpush.msra.mxu2 %v73_v32 }
  0x1e   :  { %300 = vmatpush.msra.mxu0 %v80_v38  ;;  %323 = vmatpush.msrb.mxu1 %v84_v48 }
  0x1f   :  { %278 = vmatpush.msra.mxu3 %v75_v33  ;;  %254 = vmatpush.msra.mxu2 %v72_v34 }
  0x20   :  { %1074 = vmatmul.msk.f32.vlgmr.msrb.gmra.mxu2 %vm95_vm0, %v1275_v11  ;;  %1077 = vmatmul.msk.f32.gmra.mxu3 %vm95_vm0, %v1280_v12 }
  0x21   :  { %1079 = vmatmul.msk.f32.gmra.mxu0 %vm95_vm0, %v1280_v12  ;;  %255 = vmatpush.msra.mxu2 %v71_v35 }
  0x22   :  { %367 = vmatpush.msrb.mxu3 %v94_v37  ;;  %301 = vmatpush.msra.mxu0 %v79_v42 }
  0x23   :  { %344 = vmatpush.msrb.mxu2 %v90_v36  ;;  %324 = vmatpush.msrb.mxu1 %v83_v49 }
  0x24   :  { %368 = vmatpush.msrb.mxu3 %v93_v40  ;;  %1088 = vmatmul.msk.f32.vlgmr.msrb.gmra.mxu1 %vm95_vm0, %v1275_v11 }
  0x25   :  { %345 = vmatpush.msrb.mxu2 %v89_v39 }
  0x26   :  { %369 = vmatpush.msrb.mxu3 %v92_v45 }
  0x27   :  { %346 = vmatpush.msrb.mxu2 %v88_v44 }
  0x28   :  { %1075 = vmatmul.msk.f32.gmra.mxu2 %vm95_vm0, %v1280_v12  ;;  %1084 = vmatmul.msk.f32.vlgmr.msra.gmra.mxu3 %vm95_vm0, %v1275_v11 }
  0x29   :  { %347 = vmatpush.msrb.mxu2 %v87_v46  ;;  %1086 = vmatmul.msk.f32.vlgmr.msra.gmra.mxu0 %vm95_vm0, %v1275_v11 }
  0x2a   :  { %370 = vmatpush.msrb.mxu3 %v91_v47 }
  0x2c   :  { %1089 = vmatmul.msk.f32.gmra.mxu1 %vm95_vm0, %v1280_v12 }
  0x30   :  { %1082 = vmatmul.msk.f32.vlgmr.msra.gmra.mxu2 %vm95_vm0, %v1275_v11  ;;  %1085 = vmatmul.msk.f32.gmra.mxu3 %vm95_vm0, %v1280_v12 }
  0x31   :  { %1087 = vmatmul.msk.f32.gmra.mxu0 %vm95_vm0, %v1280_v12 }
  0x38   :  { %1083 = vmatmul.msk.f32.gmra.mxu2 %vm95_vm0, %v1280_v12  ;;  %1092 = vmatmul.msk.f32.vlgmr.msrb.gmra.mxu3 %vm95_vm0, %v1275_v11 }
  0x40   :  { %1090 = vmatmul.msk.f32.vlgmr.msrb.gmra.mxu2 %vm95_vm0, %v1275_v11  ;;  %1093 = vmatmul.msk.f32.gmra.mxu3 %vm95_vm0, %v1280_v12 }
  0x48   :  { %1091 = vmatmul.msk.f32.gmra.mxu2 %vm95_vm0, %v1280_v12 }
  0x8c   :  { %v119_v50 = vpop.f32.mrf.mxu0 }
  0x90   :  { %v234_v51 = vpop.f32.mrf.mxu1 }
  0x91   :  { %1098 = vmatpush.xpose.msk.msra.mxu2 %vm95_vm0, %v234_v51 }
  0x92   :  { %v122_v52 = vpop.f32.mrf.mxu3 }
  0x93   :  { %v142_v53 = vpop.f32.mrf.mxu2 }
  0x94   :  { %1099 = vmatmul.msk.f32.vlgmr.msra.gmra.mxu2 %vm95_vm0, %v142_v53 }
  0x95   :  { %v211_v54 = vpop.f32.mrf.mxu0 }
  0x96   :  { %1094 = vmatpush.xpose.msk.msrb.mxu0 %vm95_vm0, %v211_v54 }
  0x99   :  { %v237_v55 = vpop.f32.mrf.mxu1  ;;  %1095 = vmatmul.msk.f32.vlgmr.msrb.gmra.mxu0 %vm95_vm0, %v119_v50 }
  0x9a   :  { %1100 = vmatpush.xpose.msk.msra.mxu3 %vm95_vm0, %v237_v55  ;;  %v188_v57 = vpop.f32.mrf.mxu3 }
  0x9b   :  { %v145_v56 = vpop.f32.mrf.mxu2 }
  0x9d   :  { %1101 = vmatmul.msk.f32.vlgmr.msra.gmra.mxu3 %vm95_vm0, %v145_v56 }
  0x9e   :  { %v214_v58 = vpop.f32.mrf.mxu0 }
  0x9f   :  { %1096 = vmatpush.xpose.msk.msra.mxu1 %vm95_vm0, %v214_v58 }
  0xa1   :  { %v326_v7 = vpop.f32.mrf.mxu1 }
  0xa2   :  { %1097 = vmatmul.msk.f32.vlgmr.msra.gmra.mxu1 %vm95_vm0, %v122_v52 }
  0xa3   :  { %v165_v59 = vpop.f32.mrf.mxu2  ;;  %v191_v60 = vpop.f32.mrf.mxu3 }
  0xa6   :  { %v303_v63 = vpop.f32.mrf.mxu0 }
  0xa9   :  { %v329_v8 = vpop.f32.mrf.mxu1 }
  0xab   :  { %v168_v61 = vpop.f32.mrf.mxu2  ;;  %v280_v62 = vpop.f32.mrf.mxu3 }
  0xac   :  { %1106 = vmatpush.xpose.msk.msrb.mxu2 %vm95_vm0, %v280_v62 }
  0xae   :  { %v306_v3 = vpop.f32.mrf.mxu0 }
  0xaf   :  { %1107 = vmatmul.msk.f32.vlgmr.msrb.gmra.mxu2 %vm95_vm0, %v188_v57 }
  0xb0   :  { %747 = vmatpush.msra.mxu2 %v326_v7 }
  0xb3   :  { %v257_v0 = vpop.f32.mrf.mxu2  ;;  %v283_v1 = vpop.f32.mrf.mxu3 }
  0xb4   :  { %1102 = vmatpush.xpose.msk.msra.mxu0 %vm95_vm0, %v257_v0  ;;  %1108 = vmatpush.xpose.msk.msrb.mxu3 %vm95_vm0, %v283_v1 }
  0xb7   :  { %1103 = vmatmul.msk.f32.vlgmr.msra.gmra.mxu0 %vm95_vm0, %v165_v59  ;;  %1109 = vmatmul.msk.f32.vlgmr.msrb.gmra.mxu3 %vm95_vm0, %v191_v60 }
  0xb8   :  { %701 = vmatpush.msrb.mxu0 %v303_v63  ;;  %770 = vmatpush.msra.mxu3 %v329_v8 }
  0xbb   :  { %v260_v2 = vpop.f32.mrf.mxu2  ;;  %v372_v6 = vpop.f32.mrf.mxu3 }
  0xbc   :  { %1104 = vmatpush.xpose.msk.msrb.mxu1 %vm95_vm0, %v260_v2  ;;  %839 = vmatpush.msrb.mxu2 %v372_v6 }
  0xbf   :  { %1105 = vmatmul.msk.f32.vlgmr.msrb.gmra.mxu1 %vm95_vm0, %v168_v61 }
  0xc0   :  { %724 = vmatpush.msra.mxu1 %v306_v3 }
  0xc3   :  { %v349_v4 = vpop.f32.mrf.mxu2  ;;  %v375_v9 = vpop.f32.mrf.mxu3 }
  0xc4   :  { %793 = vmatpush.msra.mxu0 %v349_v4  ;;  %862 = vmatpush.msrb.mxu3 %v375_v9 }
  0xcb   :  { %v352_v5 = vpop.f32.mrf.mxu2 }
  0xcc   :  { %816 = vmatpush.msrb.mxu1 %v352_v5 }
 0x116   :  { %v401_v15 = vpop.f32.mrf.mxu0 }
 0x117   :  { %v453_v10 = vpop.f32.mrf.mxu2  ;;  %v586_v16 = vmul.f32 0.35355338, %v401_v15 }
 0x118   :  { %v588_v13 = vmul.f32 0.35355338, %v453_v10 }
 0x119   :  { %v595_v23 = vsel %vm594_vm1, %v586_v16, -inf }
 0x11a   :  { %v601_v14 = vsel %vm594_vm1, %v588_v13, -inf }
 0x11b   :  { %602 = vmax.xlane.f32.xlu0 %v601_v14 }
 0x11f   :  { %v427_v17 = vpop.f32.mrf.mxu1 }
 0x120   :  { %v587_v18 = vmul.f32 0.35355338, %v427_v17  ;;  %v479_v19 = vpop.f32.mrf.mxu3 }
 0x121   :  { %v589_v20 = vmul.f32 0.35355338, %v479_v19 }
 0x122   :  { %v598_v21 = vsel %vm594_vm1, %v587_v18, -inf }
 0x123   :  { %599 = vmax.xlane.f32.xlu2 %v598_v21  ;;  %v604_v22 = vsel %vm594_vm1, %v589_v20, -inf  ;;  %596 = vmax.xlane.f32.xlu0 %v595_v23 }
 0x124   :  { %605 = vmax.xlane.f32.xlu1 %v604_v22 }
 0x132   :  { %v557_v24 = vpop.f32.mrf.mxu2 }
 0x133   :  { %v592_v25 = vmul.f32 0.35355338, %v557_v24 }
 0x134   :  { %v505_v26 = vpop.f32.mrf.mxu0 }
 0x135   :  { %v590_v27 = vmul.f32 0.35355338, %v505_v26  ;;  %v613_v28 = vsel %vm594_vm1, %v592_v25, -inf }
 0x136   :  { %614 = vmax.xlane.f32.xlu1 %v613_v28 }
 0x137   :  { %v607_v29 = vsel %vm594_vm1, %v590_v27, -inf }
 0x138   :  { %608 = vmax.xlane.f32.xlu2 %v607_v29 }
 0x13a   :  { %v583_v30 = vpop.f32.mrf.mxu3 }
 0x13b   :  { %v593_v31 = vmul.f32 0.35355338, %v583_v30 }
 0x13c   :  { %v531_v32 = vpop.f32.mrf.mxu1 }
 0x13d   :  { %v591_v33 = vmul.f32 0.35355338, %v531_v32  ;;  %v616_v34 = vsel %vm594_vm1, %v593_v31, -inf }
 0x13e   :  { %617 = vmax.xlane.f32.xlu0 %v616_v34 }
 0x13f   :  { %v610_v35 = vsel %vm594_vm1, %v591_v33, -inf }
 0x140   :  { %611 = vmax.xlane.f32.xlu1 %v610_v35 }
 0x18e   :  { %v603_v36 = vpop.xlane.xlu0 %602 }
 0x18f   :  { %v621_v37 = vsub.f32 %v588_v13, %v603_v36 }
 0x191   :  { %v631_v38 = vmul.f32 1.442695, %v621_v37 }
 0x193   :  { %1134 = vpow2.f32 %v631_v38  ;;  %v881_v38 = vld [vmem:[%s1461_s2 + $0x18] sm:$0xff] }
 0x196   :  { %v597_v40 = vpop.xlane.xlu0 %596  ;;  %v600_v41 = vpop.xlane.xlu2 %599 }
 0x197   :  { %v606_v39 = vpop.xlane.xlu1 %605  ;;  %v619_v43 = vsub.f32 %v586_v16, %v597_v40  ;;  %v620_v47 = vsub.f32 %v587_v18, %v600_v41  ;;  %v879_v40 = vld [vmem:[%s1461_s2 + $0x8] sm:$0xff]  ;;  %v878_v41 = vld [vmem:[%s1461_s2] sm:$0xff] }
 0x198   :  { %v622_v42 = vsub.f32 %v589_v20, %v606_v39  ;;  %v880_v39 = vld [vmem:[%s1461_s2 + $0x10] sm:$0xff] }
 0x199   :  { %v1135_v44 = vpop.eup %1134  ;;  %v627_v46 = vmul.f32 1.442695, %v619_v43  ;;  %v629_v49 = vmul.f32 1.442695, %v620_v47 }
 0x19a   :  { %v633_v45 = vmul.f32 1.442695, %v622_v42  ;;  %v649_v48 = vsel %vm594_vm1, %v1135_v44, 0.0 }
 0x19b   :  { %650 = vadd.xlane.f32.xlu2 %v649_v48 }
 0x19c   :  { %1136 = vpow2.f32 %v633_v45 }
 0x19d   :  { %1138 = vpow2.f32 %v627_v46 }
 0x19e   :  { %1140 = vpow2.f32 %v629_v49 }
 0x1a2   :  { %v1137_v50 = vpop.eup %1136 }
 0x1a3   :  { %v1139_v51 = vpop.eup %1138  ;;  %v652_v52 = vsel %vm594_vm1, %v1137_v50, 0.0 }
 0x1a4   :  { %653 = vadd.xlane.f32.xlu1 %v652_v52  ;;  %v643_v53 = vsel %vm594_vm1, %v1139_v51, 0.0  ;;  %v1141_v54 = vpop.eup %1140 }
 0x1a5   :  { %644 = vadd.xlane.f32.xlu0 %v643_v53  ;;  %v646_v59 = vsel %vm594_vm1, %v1141_v54, 0.0 }
 0x1a9   :  { %v615_v55 = vpop.xlane.xlu1 %614 }
 0x1aa   :  { %v625_v56 = vsub.f32 %v592_v25, %v615_v55 }
 0x1ab   :  { %v609_v57 = vpop.xlane.xlu2 %608 }
 0x1ac   :  { %v639_v58 = vmul.f32 1.442695, %v625_v56  ;;  %v623_v60 = vsub.f32 %v590_v27, %v609_v57 }
 0x1ad   :  { %647 = vadd.xlane.f32.xlu0 %v646_v59 }
 0x1ae   :  { %1142 = vpow2.f32 %v639_v58  ;;  %v635_v61 = vmul.f32 1.442695, %v623_v60 }
 0x1b0   :  { %1144 = vpow2.f32 %v635_v61  ;;  %v1132_v61 = vld [vmem:[%s1462_s3] ss:$0 sm:$0xff] }
 0x1b1   :  { %v618_v62 = vpop.xlane.xlu0 %617 }
 0x1b2   :  { %v626_v63 = vsub.f32 %v593_v31, %v618_v62 }
 0x1b3   :  { %v612_v0 = vpop.xlane.xlu1 %611 }
 0x1b4   :  { %v1143_v1 = vpop.eup %1142  ;;  %v641_v2 = vmul.f32 1.442695, %v626_v63  ;;  %v624_v3 = vsub.f32 %v591_v33, %v612_v0 }
 0x1b5   :  { %v661_v4 = vsel %vm594_vm1, %v1143_v1, 0.0 }
 0x1b6   :  { %v1145_v5 = vpop.eup %1144  ;;  %1146 = vpow2.f32 %v641_v2  ;;  %v637_v6 = vmul.f32 1.442695, %v624_v3  ;;  %662 = vadd.xlane.f32.xlu2 %v661_v4 }
 0x1b7   :  { %v655_v7 = vsel %vm594_vm1, %v1145_v5, 0.0 }
 0x1b8   :  { %1148 = vpow2.f32 %v637_v6  ;;  %656 = vadd.xlane.f32.xlu1 %v655_v7  ;;  %v1009_v6 = vld [vmem:[%s1463_s4 + $0x30] sm:$0xff] }
 0x1bc   :  { %v1147_v8 = vpop.eup %1146 }
 0x1bd   :  { %v664_v9 = vsel %vm594_vm1, %v1147_v8, 0.0 }
 0x1be   :  { %v1149_v10 = vpop.eup %1148  ;;  %665 = vadd.xlane.f32.xlu2 %v664_v9 }
 0x1bf   :  { %v658_v13 = vsel %vm594_vm1, %v1149_v10, 0.0 }
 0x1c0   :  { %659 = vadd.xlane.f32.xlu0 %v658_v13 }
 0x20e   :  { %v651_v14 = vpop.xlane.xlu2 %650 }
 0x20f   :  { %1150 = vrcp.f32 %v651_v14 }
 0x215   :  { %v1151_v15 = vpop.eup %1150 }
 0x216   :  { %v677_v16 = vmul.f32 %v1151_v15, %v1135_v44 }
 0x217   :  { %v654_v17 = vpop.xlane.xlu1 %653 }
 0x218   :  { %1152 = vrcp.f32 %v654_v17  ;;  %v645_v18 = vpop.xlane.xlu0 %644  ;;  %1112 = vmatmul.msk.f32.vlgmr.msra.gmra.mxu2 %vm594_vm1, %v677_v16  ;;  %v1007_v16 = vld [vmem:[%s1463_s4 + $0x20] sm:$0xff] }
 0x219   :  { %1154 = vrcp.f32 %v645_v18 }
 0x21e   :  { %v1153_v19 = vpop.eup %1152 }
 0x21f   :  { %v1155_v20 = vpop.eup %1154  ;;  %v678_v21 = vmul.f32 %v1153_v19, %v1137_v50  ;;  %v1385_v50 = vstv %s1465_s6 }
 0x220   :  { %v675_v22 = vmul.f32 %v1155_v20, %v1139_v51  ;;  %v648_v23 = vpop.xlane.xlu0 %647  ;;  %v1006_v20 = vld [vmem:[%s1463_s4 + $0x18] sm:$0xff] }
 0x221   :  { %1156 = vrcp.f32 %v648_v23  ;;  %1113 = vmatmul.msk.f32.vlgmr.msra.gmra.mxu3 %vm594_vm1, %v678_v21 }
 0x222   :  { %1110 = vmatmul.msk.f32.vlgmr.msrb.gmra.mxu0 %vm594_vm1, %v675_v22 }
 0x223   :  { %904 = vmatpush.msrb.mxu0 %v881_v38 }
 0x225   :  { %905 = vmatpush.msrb.mxu0 %v880_v39 }
 0x227   :  { %v1157_v24 = vpop.eup %1156  ;;  %906 = vmatpush.msrb.mxu0 %v879_v40 }
 0x228   :  { %v676_v25 = vmul.f32 %v1157_v24, %v1141_v54  ;;  %v1005_v24 = vld [vmem:[%s1463_s4 + $0x10] sm:$0xff] }
 0x229   :  { %v663_v26 = vpop.xlane.xlu2 %662  ;;  %907 = vmatpush.msrb.mxu0 %v878_v41 }
 0x22a   :  { %1111 = vmatmul.msk.f32.vlgmr.msra.gmra.mxu1 %vm594_vm1, %v676_v25  ;;  %1158 = vrcp.f32 %v663_v26 }
 0x22b   :  { %v657_v27 = vpop.xlane.xlu1 %656 }
 0x22c   :  { %1160 = vrcp.f32 %v657_v27 }
 0x230   :  { %v1159_v28 = vpop.eup %1158 }
 0x231   :  { %v681_v29 = vmul.f32 %v1159_v28, %v1143_v1  ;;  %v666_v30 = vpop.xlane.xlu2 %665 }
 0x232   :  { %v1161_v31 = vpop.eup %1160  ;;  %1162 = vrcp.f32 %v666_v30 }
 0x233   :  { %v679_v32 = vmul.f32 %v1161_v31, %v1145_v5  ;;  %v660_v33 = vpop.xlane.xlu0 %659  ;;  %1116 = vmatmul.msk.f32.vlgmr.msrb.gmra.mxu2 %vm594_vm1, %v681_v29  ;;  %v1004_v29 = vld [vmem:[%s1463_s4 + $0x8] sm:$0xff] }
 0x234   :  { %1164 = vrcp.f32 %v660_v33  ;;  %v1003_v33 = vld [vmem:[%s1463_s4] sm:$0xff] }
 0x235   :  { %1114 = vmatmul.msk.f32.vlgmr.msra.gmra.mxu0 %vm594_vm1, %v679_v32 }
 0x238   :  { %v1163_v34 = vpop.eup %1162 }
 0x239   :  { %v682_v35 = vmul.f32 %v1163_v34, %v1147_v8 }
 0x23a   :  { %v1165_v36 = vpop.eup %1164 }
 0x23b   :  { %v680_v37 = vmul.f32 %v1165_v36, %v1149_v10  ;;  %1117 = vmatmul.msk.f32.vlgmr.msrb.gmra.mxu3 %vm594_vm1, %v682_v35  ;;  %v1008_v10 = vld [vmem:[%s1463_s4 + $0x28] sm:$0xff] }
 0x23d   :  { %1115 = vmatmul.msk.f32.vlgmr.msrb.gmra.mxu1 %vm594_vm1, %v680_v37 }
 0x29b   :  { %v749_v43 = vpop.f32.mrf.mxu2 }
 0x29f   :  { %v703_v42 = vpop.f32.mrf.mxu0 }
 0x2a0   :  { %v867_v46 = vadd.f32 %v749_v43, %v703_v42 }
 0x2a4   :  { %v772_v48 = vpop.f32.mrf.mxu3 }
 0x2a7   :  { %v726_v44 = vpop.f32.mrf.mxu1 }
 0x2a8   :  { %v868_v54 = vadd.f32 %v772_v48, %v726_v44 }
 0x2b2   :  { %v795_v45 = vpop.f32.mrf.mxu0 }
 0x2b3   :  { %v869_v47 = vadd.f32 %v867_v46, %v795_v45 }
 0x2b6   :  { %v841_v49 = vpop.f32.mrf.mxu2 }
 0x2b7   :  { %v871_v51 = vadd.f32 %v869_v47, %v841_v49 }
 0x2b9   :  { %v874_v52 = vmul.f32 %v1385_v50, %v871_v51 }
 0x2ba   :  { %v818_v53 = vpop.f32.mrf.mxu1 }
 0x2bb   :  { %v1389_v55 = vadd.f32 %v874_v52, %v1275_v11  ;;  %v870_v56 = vadd.f32 %v868_v54, %v818_v53 }
 0x2bd   :  { %1118 = vmatmul.msk.f32.vlgmr.msrb.gmra.mxu0 %vm95_vm0, %v1389_v55 }
 0x2be   :  { %v864_v57 = vpop.f32.mrf.mxu3 }
 0x2bf   :  { %v872_v58 = vadd.f32 %v870_v56, %v864_v57 }
 0x2c1   :  { %v875_v59 = vmul.f32 %v1385_v50, %v872_v58 }
 0x2c3   :  { %v1395_v60 = vadd.f32 %v875_v59, %v1280_v12  ;;  %v1010_v12 = vld [vmem:[%s1463_s4 + $0x38] sm:$0xff] }
 0x2c4   :  { %1030 = vmatpush.msra.mxu1 %v1010_v12 }
 0x2c5   :  { %1119 = vmatmul.msk.f32.gmra.mxu0 %vm95_vm0, %v1395_v60 }
 0x2c6   :  { %1031 = vmatpush.msra.mxu1 %v1009_v6 }
 0x2c8   :  { %1032 = vmatpush.msra.mxu1 %v1008_v10 }
 0x2ca   :  { %1033 = vmatpush.msra.mxu1 %v1007_v16 }
 0x2cc   :  { %1034 = vmatpush.msra.mxu1 %v1006_v20 }
 0x2ce   :  { %1035 = vmatpush.msra.mxu1 %v1005_v24 }
 0x2d0   :  { %1036 = vmatpush.msra.mxu1 %v1004_v29 }
 0x2d2   :  { %1037 = vmatpush.msra.mxu1 %v1003_v33 }
 0x33a   :  { %v909_v11 = vpop.f32.mrf.mxu0 }
 0x33b   :  { %v1402_v62 = vadd.f32 %v1132_v61, %v909_v11 }
 0x33d   :  { %v1405_v63 = vmul.f32 0.70710677, %v1402_v62 }
 0x33f   :  { %v919_v0 = vmul.f32 %v1405_v63, %v1405_v63 }
 0x341   :  { %v920_v1 = vmin.f32 %v919_v0, 16.0 }
 0x342   :  { %v912_v2 = vpop.f32.mrf.mxu0 }
 0x343   :  { %v921_v3 = vmul.f32 2.1237322e-06, %v920_v1  ;;  %v932_v4 = vmul.f32 3.8918573e-05, %v920_v1  ;;  %v1412_v5 = vadd.f32 %v1132_v61, %v912_v2 }
 0x345   :  { %v922_v7 = vadd.f32 0.00028619796, %v921_v3  ;;  %v933_v8 = vadd.f32 0.001143296, %v932_v4  ;;  %v1418_v9 = vmul.f32 0.70710677, %v1412_v5 }
 0x347   :  { %v923_v13 = vmul.f32 %v922_v7, %v920_v1  ;;  %v934_v14 = vmul.f32 %v933_v8, %v920_v1  ;;  %v959_v15 = vmul.f32 %v1418_v9, %v1418_v9 }
 0x349   :  { %v935_v17 = vadd.f32 0.014752088, %v934_v14  ;;  %v924_v18 = vadd.f32 0.0036580483, %v923_v13  ;;  %v960_v19 = vmin.f32 %v959_v15, 16.0 }
 0x34b   :  { %v936_v21 = vmul.f32 %v935_v17, %v920_v1  ;;  %v961_v22 = vmul.f32 2.1237322e-06, %v960_v19  ;;  %v972_v23 = vmul.f32 3.8918573e-05, %v960_v19  ;;  %v925_v26 = vmul.f32 %v924_v18, %v920_v1 }
 0x34c   :  { %v915_v18 = vmul.f32 0.5, %v1402_v62  ;;  %v1133_v62 = vld [vmem:[%s1464_s5] ss:$0 sm:$0xff] }
 0x34d   :  { %v937_v25 = vadd.f32 0.112945676, %v936_v21  ;;  %v962_v27 = vadd.f32 0.00028619796, %v961_v22  ;;  %v973_v28 = vadd.f32 0.001143296, %v972_v23 }
 0x34e   :  { %v926_v35 = vadd.f32 0.05243302, %v925_v26 }
 0x34f   :  { %v938_v30 = vmul.f32 %v937_v25, %v920_v1  ;;  %v963_v31 = vmul.f32 %v962_v27, %v960_v19  ;;  %v974_v32 = vmul.f32 %v973_v28, %v960_v19  ;;  %v916_v27 = vmul.f32 0.5, %v1412_v5 }
 0x350   :  { %v927_v41 = vmul.f32 %v926_v35, %v920_v1 }
 0x351   :  { %v939_v34 = vadd.f32 0.4994258, %v938_v30  ;;  %v975_v36 = vadd.f32 0.014752088, %v974_v32  ;;  %v964_v38 = vadd.f32 0.0036580483, %v963_v31 }
 0x352   :  { %v928_v45 = vadd.f32 0.18741608, %v927_v41 }
 0x353   :  { %v940_v37 = vmul.f32 %v939_v34, %v920_v1  ;;  %v976_v39 = vmul.f32 %v975_v36, %v960_v19  ;;  %v965_v43 = vmul.f32 %v964_v38, %v960_v19 }
 0x354   :  { %v929_v51 = vmul.f32 %v928_v45, %v920_v1 }
 0x355   :  { %v941_v40 = vadd.f32 1.0, %v940_v37  ;;  %v977_v42 = vadd.f32 0.112945676, %v976_v39  ;;  %v966_v47 = vadd.f32 0.05243302, %v965_v43 }
 0x356   :  { %v930_v58 = vadd.f32 1.1283791, %v929_v51 }
 0x357   :  { %1166 = vrcp.f32 %v941_v40  ;;  %v978_v44 = vmul.f32 %v977_v42, %v960_v19  ;;  %v967_v54 = vmul.f32 %v966_v47, %v960_v19  ;;  %v953_v57 = vand.u32 2147483648, %v941_v40 }
 0x358   :  { %v951_v61 = vand.u32 2147483647, %v941_v40  ;;  %vm947_vm3 = vweird.f32 %v941_v40  ;;  %v931_v3 = vmul.f32 %v930_v58, %v1405_v63 }
 0x359   :  { %v979_v46 = vadd.f32 0.4994258, %v978_v44  ;;  %v968_v11 = vadd.f32 0.18741608, %v967_v54  ;;  %v954_v2 = vor.u32 1.1754944e-38, %v953_v57 }
 0x35a   :  { %vm952_vm5 = vcmp.eq.f32.partialorder %v951_v61, 8.507059e+37 }
 0x35b   :  { %v980_v48 = vmul.f32 %v979_v46, %v960_v19  ;;  %v969_v6 = vmul.f32 %v968_v11, %v960_v19 }
 0x35d   :  { %v1167_v49 = vpop.eup %1166  ;;  %v981_v53 = vadd.f32 1.0, %v980_v48  ;;  %v970_v15 = vadd.f32 1.1283791, %v969_v6 }
 0x35e   :  { %v943_v52 = vmul.f32 %v1167_v49, %v941_v40  ;;  %vm948_vm2 = vweird.f32 %v1167_v49 }
 0x35f   :  { %1168 = vrcp.f32 %v981_v53  ;;  %vm949_vm4 = vmor %vm947_vm3, %vm948_vm2  ;;  %v993_v14 = vand.u32 2147483648, %v981_v53  ;;  %v991_v17 = vand.u32 2147483647, %v981_v53  ;;  %vm987_vm7 = vweird.f32 %v981_v53 }
 0x360   :  { %v944_v56 = vsub.f32 1.0, %v943_v52  ;;  %v971_v19 = vmul.f32 %v970_v15, %v1418_v9 }
 0x361   :  { %v994_v22 = vor.u32 1.1754944e-38, %v993_v14  ;;  %vm992_vm10 = vcmp.eq.f32.partialorder %v991_v17, 8.507059e+37 }
 0x362   :  { %v945_v59 = vmul.f32 %v1167_v49, %v944_v56 }
 0x364   :  { %v946_v0 = vadd.f32 %v1167_v49, %v945_v59 }
 0x365   :  { %v1169_v12 = vpop.eup %1168 }
 0x366   :  { %v950_v4 = vsel %vm949_vm4, %v1167_v49, %v946_v0  ;;  %v983_v7 = vmul.f32 %v1169_v12, %v981_v53  ;;  %vm988_vm6 = vweird.f32 %v1169_v12 }
 0x367   :  { %v955_v1 = vsel %vm952_vm5, %v954_v2, %v950_v4  ;;  %vm989_vm9 = vmor %vm987_vm7, %vm988_vm6 }
 0x368   :  { %v956_v8 = vmul.f32 %v955_v1, %v931_v3  ;;  %v984_v10 = vsub.f32 1.0, %v983_v7 }
 0x36a   :  { %v1120_v13 = vclamps-f32 %v956_v8, 1.0  ;;  %v985_v16 = vmul.f32 %v1169_v12, %v984_v10 }
 0x36c   :  { %v999_v20 = vadd.f32 1.0, %v1120_v13  ;;  %v986_v21 = vadd.f32 %v1169_v12, %v985_v16 }
 0x36e   :  { %v1001_v63 = vmul.f32 %v999_v20, %v915_v18  ;;  %v990_v23 = vsel %vm989_vm9, %v1169_v12, %v986_v21 }
 0x36f   :  { %v995_v24 = vsel %vm992_vm10, %v994_v22, %v990_v23 }
 0x370   :  { %1122 = vmatmul.msk.f32.vlgmr.msra.gmra.mxu1 %vm1015_vm8, %v1001_v63  ;;  %v996_v25 = vmul.f32 %v995_v24, %v971_v19 }
 0x372   :  { %v1121_v26 = vclamps-f32 %v996_v25, 1.0 }
 0x374   :  { %v1000_v28 = vadd.f32 1.0, %v1121_v26 }
 0x376   :  { %v1002_v29 = vmul.f32 %v1000_v28, %v916_v27 }
 0x378   :  { %1123 = vmatmul.msk.f32.gmra.mxu1 %vm1015_vm8, %v1002_v29 }
 0x3ed   :  { %v1039_v30 = vpop.f32.mrf.mxu1 }
 0x3ee   :  { %v1040_v31 = vadd.f32 %v1133_v62, %v1039_v30 }
 0x3f0   :  { %v1045_v32 = vmul.f32 %v1040_v31, %v1385_v50 }
 0x3f2   :  { %v1047_v9 = vadd.f32 %v1045_v32, %v1389_v55 }
 0x3f4   :  { %1049 = vst.msk [vmem:[#allocation6] sm:$0xff] %vm95_vm0, %v1047_v9 }
 0x3f5   :  { %v1042_v33 = vpop.f32.mrf.mxu1 }
 0x3f6   :  { %v1043_v34 = vadd.f32 %v1133_v62, %v1042_v33 }
 0x3f8   :  { %v1046_v5 = vmul.f32 %v1043_v34, %v1385_v50 }
 0x3fa   :  { %v1048_v35 = vadd.f32 %v1046_v5, %v1395_v60 }
 0x3fc   :  { %1050 = vst.msk [vmem:[#allocation6 + $0x8] sm:$0xff] %vm95_vm0, %v1048_v35 }
 0x3fd   :  { %1063 = dma.vmem_to_hbm [thread:$0]  %s1056_s14, 256, %s1058_s17, [#allocation5], %s1223_s29, %s1223_s29, %s1224_s30  }
 0x3fe   :  { %1220 = dma.done.wait [#allocation5], 256  }
 0x3ff   :  { %1221 = vsyncadd [#allocation5], 4294967040 }
 0x400   :  { %1068 = vsyncpa [#allocation4], 1 }
 0x401   :  { %1069 = vsyncpa [#allocation5], 1 }

</bundles_post_ra>
